<compile_context>
chip_gen: v5e
topology: v5e:2x2
jax: 0.10.0
libtpu: 0.0.40
codegen_flags: <defaults>
</compile_context>

<pallas_src>
import math

import jax
import jax.numpy as jnp
from jax.experimental import pallas as pl
from jax.experimental.pallas import tpu as pltpu

_LANE = 128
_SUBLANE_F32 = 8
_MAX_COL_TILE = 16384


def make_pe_table(seq_len: int, d_model: int) -> jnp.ndarray:
    """Deterministic sinusoidal positional-encoding buffer, shape (S, D)."""
    pos = jnp.arange(seq_len, dtype=jnp.float32)[:, None]                # (S, 1)
    div_term = jnp.exp(
        jnp.arange(0, d_model, 2, dtype=jnp.float32)
        * (-math.log(10000.0) / d_model)
    )                                                                    # (D/2,)
    angles = pos * div_term[None, :]                                     # (S, D/2)
    pe = jnp.zeros((seq_len, d_model), dtype=jnp.float32)
    pe = pe.at[:, 0::2].set(jnp.sin(angles))
    pe = pe.at[:, 1::2].set(jnp.cos(angles))
    return pe


# ---------------- device / tiling helpers ----------------

def _device_budget():
    """(max_block_bytes, vmem_limit_bytes or None, num_tensorcores)."""
    kind, platform = "", ""
    try:
        d = jax.devices()[0]
        kind = (getattr(d, "device_kind", "") or "").lower()
        platform = (getattr(d, "platform", "") or "").lower()
    except Exception:
        pass
    if platform != "tpu":
        return 2 << 20, None, 1
    if "v7" in kind:
        # 3.2 TB/s HBM, 64 MiB physical VMEM, 2 TCs: big blocks, explicit limit.
        return 8 << 20, 48 << 20, 2
    if "v6" in kind:
        return 4 << 20, 64 << 20, 1
    # v5e / v5p / unknown TPU: stay under the 16 MiB scoped-VMEM default.
    return 2 << 20, None, 1


def _divisor_tile(n: int, unit: int, max_tile: int):
    """Largest multiple of `unit` that divides n and is <= max_tile (or None)."""
    if unit <= 0 or n % unit != 0 or max_tile < unit:
        return None
    m = n // unit
    for d in range(min(m, max_tile // unit), 0, -1):
        if m % d == 0:
            return d * unit
    return None


def _pick_tile(n: int, unit: int, max_tile: int) -> int:
    """Tile size <= max_tile. Prefers exact divisors; otherwise a fixed
    unit-multiple tile (grid then uses pl.cdiv and Pallas masks the edge)."""
    if n <= max_tile:
        return n
    t = _divisor_tile(n, unit, max_tile)
    if t is not None:
        return t
    return max(unit, (max_tile // unit) * unit)


def _choose_tiles(rows: int, cols: int, itemsize: int, sublane: int,
                  max_block_bytes: int):
    tc = _pick_tile(cols, _LANE, _MAX_COL_TILE)              # lane-dense column tile
    max_rows = max(sublane, max_block_bytes // max(tc * itemsize, 1))
    tr = _pick_tile(rows, sublane, max_rows)
    return tr, tc


def _ensure_multi_block(tr, tc, rows, cols, sublane, num_cores):
    """On multi-TensorCore chips make sure the grid has >= 2 blocks."""
    if num_cores <= 1:
        return tr, tc
    if pl.cdiv(cols, tc) * pl.cdiv(rows, tr) >= 2:
        return tr, tc
    if cols >= 2 * _LANE:
        t = _divisor_tile(cols, _LANE, cols // 2)
        if t is not None:
            return tr, t
    if rows >= 2 * sublane:
        t = _divisor_tile(rows, sublane, rows // 2)
        if t is not None:
            return t, tc
    return tr, tc


# ---------------- kernels ----------------

def _pe_add_kernel(x_ref, pe_ref, o_ref):
    # eval-mode dropout is identity: (tr, tc) + (1, tc) broadcast add.
    o_ref[...] = x_ref[...] + pe_ref[...]


def _pe_add_dropout_kernel(x_ref, pe_ref, m_ref, o_ref):
    # m is a pre-scaled inverted-dropout mask: 0 or 1/keep, same dtype as x.
    o_ref[...] = (x_ref[...] + pe_ref[...]) * m_ref[...]


# ---------------- wrapper ----------------

def positional_encoding_forward(x, pe, *, dropout_p: float = 0.0,
                                training: bool = False, rng_key=None,
                                donate_x: bool = False):
    """x: (B, S, D); pe: (S_max, D) with S_max >= S. Returns dropout(x + pe[:S])."""
    B, S, D = x.shape
    rows, cols = B, S * D
    x2 = x.reshape(rows, cols)
    pe2 = pe[:S, :].astype(x.dtype).reshape(1, cols)

    itemsize = jnp.dtype(x.dtype).itemsize
    sublane = max(_SUBLANE_F32, (_SUBLANE_F32 * 4) // max(itemsize, 1))

    use_dropout = bool(training) and dropout_p > 0.0

    max_block, vmem_limit, num_cores = _device_budget()
    if use_dropout:
        # extra streamed mask input -> halve the per-block budget for headroom
        max_block = max(max_block // 2, 512 * 1024)

    tr, tc = _choose_tiles(rows, cols, itemsize, sublane, max_block)
    tr, tc = _ensure_multi_block(tr, tc, rows, cols, sublane, num_cores)
    # Column (S*D) axis OUTER, batch-row axis INNER -> pe block index constant
    # across the inner loop, so the pe tile is not re-DMA'd per batch row.
    grid = (pl.cdiv(cols, tc), pl.cdiv(rows, tr))

    x_spec = pl.BlockSpec((tr, tc), lambda j, i: (i, j))
    pe_spec = pl.BlockSpec((1, tc), lambda j, i: (0, j))
    out_spec = pl.BlockSpec((tr, tc), lambda j, i: (i, j))
    out_shape = jax.ShapeDtypeStruct((rows, cols), x.dtype)

    cp_kwargs = dict(dimension_semantics=("parallel", "parallel"))
    if vmem_limit is not None:
        cp_kwargs["vmem_limit_bytes"] = int(vmem_limit)
    compiler_params = pltpu.CompilerParams(**cp_kwargs)

    # x2 and the output have identical shape/dtype; alias only when the caller
    # guarantees x is dead after this call.
    io_alias = {0: 0} if donate_x else {}

    if use_dropout:
        if rng_key is None:
            rng_key = jax.random.PRNGKey(0)
        keep_p = 1.0 - float(dropout_p)
        mask2 = (jax.random.bernoulli(rng_key, keep_p, (rows, cols))
                 .astype(x.dtype) * jnp.asarray(1.0 / keep_p, dtype=x.dtype))
        out2 = pl.pallas_call(
            _pe_add_dropout_kernel,
            out_shape=out_shape,
            grid=grid,
            in_specs=[x_spec, pe_spec, x_spec],
            out_specs=out_spec,
            compiler_params=compiler_params,
            input_output_aliases=io_alias,
        )(x2, pe2, mask2)
    else:
        out2 = pl.pallas_call(
            _pe_add_kernel,
            out_shape=out_shape,
            grid=grid,
            in_specs=[x_spec, pe_spec],
            out_specs=out_spec,
            compiler_params=compiler_params,
            input_output_aliases=io_alias,
        )(x2, pe2)

    return out2.reshape(B, S, D)


if __name__ == "__main__":
    # small shapes consistent with the module: batch=2, seq=8, d_model=32
    B, S, D = 2, 8, 32
    seq_len_max = 16          # module's seq_len (buffer length); forward slices to S
    dropout_p = 0.1

    key = jax.random.PRNGKey(0)
    x_key, drop_key = jax.random.split(key)
    x = jax.random.normal(x_key, (B, S, D), dtype=jnp.float32)
    pe = make_pe_table(seq_len_max, D)

    # reference (eval-mode dropout == identity)
    ref = x + pe[None, :S, :]

    # ---- eval path ----
    out = positional_encoding_forward(x, pe, dropout_p=dropout_p, training=False)
    out = jax.block_until_ready(out)
    assert out.shape == (B, S, D)
    assert jnp.allclose(out, ref, atol=1e-6, rtol=1e-6)

    # ---- training path (inverted dropout): each element is 0 or ~ref/keep ----
    out_tr = positional_encoding_forward(x, pe, dropout_p=dropout_p,
                                         training=True, rng_key=drop_key)
    out_tr = jax.block_until_ready(out_tr)
    assert out_tr.shape == (B, S, D)
    keep = 1.0 - dropout_p
    scaled = ref / keep
    ok = jnp.isclose(out_tr, 0.0, atol=1e-6) | jnp.isclose(out_tr, scaled,
                                                           atol=1e-5, rtol=1e-5)
    assert bool(jnp.all(ok))

    # TODO(synk): x.requires_grad_(False) is autograd bookkeeping only; it has no
    # Pallas/JAX runtime equivalent and does not affect forward values.
    print("KERNEL_OK")
</pallas_src>

<mosaic_0001>
module attributes {stable_mosaic.version = 11 : i64} {
  func.func @_pe_add_kernel(%arg0: i32, %arg1: i32, %arg2: memref<2x256xf32, #tpu.memory_space<vmem>>, %arg3: memref<1x256xf32, #tpu.memory_space<vmem>>, %arg4: memref<2x256xf32, #tpu.memory_space<vmem>>) attributes {dimension_semantics = [#tpu.dimension_semantics<parallel>, #tpu.dimension_semantics<parallel>], iteration_bounds = array<i64: 1, 1>, scalar_prefetch = 0 : i64, scratch_operands = 0 : i64, tpu.core_type = #tpu.core_type<tc>, window_params = [{transform_indices = @transform_0, window_bounds = array<i64: 2, 256>}, {transform_indices = @transform_1, window_bounds = array<i64: 1, 256>}, {transform_indices = @transform_2, window_bounds = array<i64: 2, 256>}]} {
    %c0 = arith.constant 0 : index
    %c0_0 = arith.constant 0 : index
    %0 = vector.load %arg2[%c0, %c0_0] : memref<2x256xf32, #tpu.memory_space<vmem>>, vector<2x256xf32>
    %c0_1 = arith.constant 0 : index
    %c0_2 = arith.constant 0 : index
    %1 = vector.load %arg3[%c0_1, %c0_2] : memref<1x256xf32, #tpu.memory_space<vmem>>, vector<1x256xf32>
    %2 = vector.broadcast %1 : vector<1x256xf32> to vector<2x256xf32>
    %3 = arith.addf %0, %2 : vector<2x256xf32>
    %c0_3 = arith.constant 0 : index
    %c0_4 = arith.constant 0 : index
    %4 = vector.load %arg4[%c0_3, %c0_4] : memref<2x256xf32, #tpu.memory_space<vmem>>, vector<2x256xf32>
    tpu.vector_store %arg4[%c0_3, %c0_4], %3 {strides = array<i32>} : memref<2x256xf32, #tpu.memory_space<vmem>>, vector<2x256xf32>,
    return
  }
  func.func @transform_0(%arg0: i32, %arg1: i32) -> (i32, i32) {
    %c0_i32 = arith.constant 0 : i32
    return %arg1, %arg0 : i32, i32
  }
  func.func @transform_1(%arg0: i32, %arg1: i32) -> (i32, i32) {
    %c0_i32 = arith.constant 0 : i32
    %c0_i32_0 = arith.constant 0 : i32
    return %c0_i32, %arg0 : i32, i32
  }
  func.func @transform_2(%arg0: i32, %arg1: i32) -> (i32, i32) {
    %c0_i32 = arith.constant 0 : i32
    return %arg1, %arg0 : i32, i32
  }
}

</mosaic_0001>

<bundles_post_ra>
// kernel: tpu_custom_call.1
= control target key start
LH: loop header
LB: loop body
LE: loop exit
PB: predicated region body
PF: predicated region fallthrough
CT: control target
= control target key end

     0   :  { %7 = vsyncpa [#allocation3], 0  ;;  %s177_s0 = inlined_call_operand.hbm [shape: f32[2,256], index: 0, kind: input, shape index: {}]   ;;  %s178_s1 = inlined_call_operand.hbm [shape: f32[1,256], index: 1, kind: input, shape index: {}]   ;;  %s179_s2 = inlined_call_operand.hbm [shape: f32[2,256], index: 2, kind: output, shape index: {}]  }
   0x1   :  { %8 = vsyncpa [#allocation6], 0 }
   0x2   :  { %9 = vsyncpa [#allocation4], 0  ;;  %s15_s11 = sshll.u32 %s177_s0, 4  ;;  %s150_s12 = smov [#allocation2]   ;;  %s16_s11 = int_to_ptr.hbm [resolvable:$true] %s15_s11 }
   0x3   :  { %s17_s13 = sshll.u32 %s150_s12, 4  ;;  %s26_s16 = sshll.u32 %s178_s1, 4  ;;  %s18_s13 = int_to_ptr.vmem [resolvable:$true] %s17_s13  ;;  %s27_s16 = int_to_ptr.hbm [resolvable:$true] %s26_s16 }
   0x4   :  { %20 = dma.hbm_to_vmem [thread:$0]  %s16_s11, 64, %s18_s13, [#allocation3]  }
   0x5   :  { %s151_s17 = smov [#allocation5]  }
   0x6   :  { %s28_s18 = sshll.u32 %s151_s17, 4  ;;  %s29_s18 = int_to_ptr.vmem [resolvable:$true] %s28_s18 }
   0x7   :  { %31 = dma.hbm_to_vmem [thread:$0]  %s27_s16, 32, %s29_s18, [#allocation6]  }
   0x8   :  { %144 = dma.done.wait [#allocation3], 64  }
   0x9   :  { %145 = vsyncadd [#allocation3], 4294967232 }
   0xa   :  { %146 = dma.done.wait [#allocation6], 32  }
   0xb   :  { %147 = vsyncadd [#allocation6], 4294967264  ;;  %v41_v0 = vld [vmem:[#allocation5] sm:$0x3]  ;;  %vm46_vm0 = vcmask 1041408   ;;  %s152_s0 = smov [#allocation7]  }
   0xc   :  { %v43_v1 = vperm.slane %v41_v0, 0  ;;  %v44_v2 = vperm.slane %v41_v0, 1  ;;  %v40_v3 = vld [vmem:[#allocation2] sm:$0xf]  ;;  %s56_s19 = sshll.u32 %s152_s0, 4  ;;  %s58_s21 = sshll.u32 %s179_s2, 4  ;;  %s57_s19 = int_to_ptr.vmem [resolvable:$true] %s56_s19  ;;  %s59_s21 = int_to_ptr.hbm [resolvable:$true] %s58_s21 }
   0xe   :  { %v45_v4 = vrot.slane %v44_v2, 6 }
  0x10   :  { %v47_v5 = vsel %vm46_vm0, %v43_v1, %v45_v4 }
  0x11   :  { %v49_v6 = vadd.f32 %v47_v5, %v40_v3 }
  0x13   :  { %50 = vst [vmem:[#allocation7] sm:$0xf] %v49_v6 }
  0x14   :  { %61 = dma.vmem_to_hbm [thread:$0]  %s57_s19, 64, %s59_s21, [#allocation4]  }
  0x15   :  { %148 = dma.done.wait [#allocation4], 64  }
  0x16   :  { %149 = vsyncadd [#allocation4], 4294967232 }
  0x17   :  { %66 = vsyncpa [#allocation3], 1 }
  0x18   :  { %67 = vsyncpa [#allocation6], 1 }
  0x19   :  { %68 = vsyncpa [#allocation4], 1 }

</bundles_post_ra>
